<compile_context>
chip_gen: v7x
topology: tpu7x:2x2x1
jax: 0.10.0
libtpu: 0.0.40
codegen_flags: <defaults>
</compile_context>

<pallas_src>
import functools

import jax
import jax.numpy as jnp
from jax import lax
from jax.experimental import pallas as pl
from jax.experimental.pallas import tpu as pltpu


# ----------------------------- fused Pallas kernel ----------------------------

def make_fused_kernel(num_layers, T, Bp, H):
    """Builds the fused kernel for a fixed (static) network configuration."""
    G = 4 * H          # per-direction gate width (PyTorch order i, f, g, o)

    def lstm_gate_step(gates, c):
        # gates: (Bp, 4H) float32
        i = jax.nn.sigmoid(gates[:, 0:H])
        f = jax.nn.sigmoid(gates[:, H:2 * H])
        g = jnp.tanh(gates[:, 2 * H:3 * H])
        o = jax.nn.sigmoid(gates[:, 3 * H:4 * H])
        c_new = f * c + i * g
        h_new = o * jnp.tanh(c_new)
        return h_new, c_new

    def kernel(*refs):
        # ---- positional ref parsing -----------------------------------------
        idx = 0
        x_ref = refs[idx]; idx += 1                      # (T*Bp, E)
        layer_refs = []
        for _ in range(num_layers):
            layer_refs.append(refs[idx:idx + 4])         # wih_cat, whh_f, whh_b, b_cat
            idx += 4
        fcw_ref = refs[idx]; idx += 1                    # (2H, Op)
        fcb_ref = refs[idx]; idx += 1                    # (1, Op), padded lanes = -1e30
        out_ref = refs[idx]; idx += 1                    # (T*Bp, Op)
        act_a = refs[idx]; idx += 1                      # (T*Bp, 2H) scratch
        act_b = refs[idx]; idx += 1                      # (T*Bp, 2H) scratch
        gx_ref = refs[idx]; idx += 1                     # (T*Bp, 8H) scratch

        acts = [act_a, act_b]
        src = x_ref
        for l in range(num_layers):
            wih_ref, whhf_ref, whhb_ref, b_ref = layer_refs[l]
            dst = acts[l % 2]

            # Hoisted input projection for BOTH directions + fused bias:
            # one (T*Bp, D_in) @ (D_in, 8H) MXU matmul, lane-dense output.
            gx_ref[...] = (jnp.dot(src[...], wih_ref[...],
                                   preferred_element_type=jnp.float32)
                           + b_ref[...])

            whh_f = whhf_ref[...]                        # (H, 4H)
            whh_b = whhb_ref[...]                        # (H, 4H)
            zeros = jnp.zeros((Bp, H), jnp.float32)

            def body(s, carry, whh_f=whh_f, whh_b=whh_b, dst=dst):
                hf, cf, hb, cb = carry
                tf = pl.multiple_of(s * Bp, Bp)               # fwd time step s
                tb = pl.multiple_of((T - 1 - s) * Bp, Bp)     # bwd time step T-1-s

                # Only the recurrent matmuls stay on the serial path; the two
                # directions are independent and issued back-to-back.
                gates_f = gx_ref[pl.ds(tf, Bp), 0:G] + jnp.dot(
                    hf, whh_f, preferred_element_type=jnp.float32)
                gates_b = gx_ref[pl.ds(tb, Bp), G:2 * G] + jnp.dot(
                    hb, whh_b, preferred_element_type=jnp.float32)

                hf, cf = lstm_gate_step(gates_f, cf)
                hb, cb = lstm_gate_step(gates_b, cb)

                # Single (T*Bp, 2H) activation slab; fwd -> lanes [0,H),
                # bwd -> lanes [H,2H). Next layer consumes it directly.
                dst[pl.ds(tf, Bp), 0:H] = hf
                dst[pl.ds(tb, Bp), H:2 * H] = hb
                return hf, cf, hb, cb

            lax.fori_loop(0, T, body,
                          (zeros, zeros, zeros, zeros))
            src = dst

        # ---- FC + log_softmax over the lane-padded output width --------------
        logits = (jnp.dot(src[...], fcw_ref[...],
                          preferred_element_type=jnp.float32)
                  + fcb_ref[...])                         # padded lanes ~ -1e30
        m = jnp.max(logits, axis=-1, keepdims=True)
        z = logits - m
        lse = jnp.log(jnp.sum(jnp.exp(z), axis=-1, keepdims=True))
        out_ref[...] = z - lse

    return kernel


# ---------------------------------- wrapper ------------------------------------

_VMEM_SPEC = functools.partial(pl.BlockSpec, memory_space=pltpu.MemorySpace.VMEM)


def bilstm_ner_forward(token_ids, params):
    """token_ids: (B, T) int32 -> log-probs (B, T, output_dim)."""
    # Embedding lookup on the frozen table is a gather -> plain-JAX glue.
    emb = jnp.take(params["embedding"], token_ids, axis=0)       # (B, T, E)
    B, T, E = emb.shape
    H = params["layers"][0]["whh_f"].shape[0]
    num_layers = len(params["layers"])
    O = params["fc_w"].shape[1]

    Bp = ((B + 7) // 8) * 8           # pad batch to full sublanes
    Op = ((O + 127) // 128) * 128     # pad FC output to full lanes

    # Time-major, batch-padded, flattened to (T*Bp, E); row index = t*Bp + b.
    x = jnp.transpose(emb, (1, 0, 2)).astype(jnp.float32)        # (T, B, E)
    if Bp != B:
        x = jnp.pad(x, ((0, 0), (0, Bp - B), (0, 0)))
    x = x.reshape(T * Bp, E)

    inputs = [x]
    for layer in params["layers"]:
        wih_cat = jnp.concatenate([layer["wih_f"], layer["wih_b"]], axis=1)  # (D_in, 8H)
        b_cat = jnp.concatenate([layer["b_f"], layer["b_b"]], axis=1)        # (1, 8H)
        inputs += [wih_cat, layer["whh_f"], layer["whh_b"], b_cat]

    fc_w_pad = jnp.pad(params["fc_w"], ((0, 0), (0, Op - O)))                # (2H, Op)
    fc_b_pad = jnp.pad(params["fc_b"], ((0, 0), (0, Op - O)),
                       constant_values=-1e30)                                # (1, Op)
    inputs += [fc_w_pad, fc_b_pad]

    kernel = make_fused_kernel(num_layers, T, Bp, H)
    out = pl.pallas_call(
        kernel,
        out_shape=jax.ShapeDtypeStruct((T * Bp, Op), jnp.float32),
        in_specs=[_VMEM_SPEC()] * len(inputs),
        out_specs=_VMEM_SPEC(),
        scratch_shapes=[
            pltpu.VMEM((T * Bp, 2 * H), jnp.float32),   # layer activations (ping)
            pltpu.VMEM((T * Bp, 2 * H), jnp.float32),   # layer activations (pong)
            pltpu.VMEM((T * Bp, 8 * H), jnp.float32),   # precomputed input-gate slab
        ],
    )(*inputs)

    out = out.reshape(T, Bp, Op)
    out = jnp.transpose(out, (1, 0, 2))[:B, :, :O]                # (B, T, O)
    return out


# ----------------------- deterministic parameter init -------------------------

def init_params(key, vocab_size, embedding_dim, hidden_dim, num_layers,
                output_dim, pad_idx=0):
    keys = jax.random.split(key, 2 + num_layers)
    k = 1.0 / jnp.sqrt(hidden_dim)

    emb = 0.1 * jax.random.normal(keys[0], (vocab_size, embedding_dim),
                                  jnp.float32)
    emb = emb.at[pad_idx].set(0.0)   # padding_idx row is zero (frozen table)

    layers = []
    for l in range(num_layers):
        d_in = embedding_dim if l == 0 else 2 * hidden_dim
        lk = jax.random.split(keys[2 + l], 12)

        def u(kk, shape):
            return jax.random.uniform(kk, shape, jnp.float32, -k, k)

        layer = {
            # stored pre-transposed for x @ W: (d_in, 4H), (H, 4H)
            "wih_f": u(lk[0], (4 * hidden_dim, d_in)).T,
            "whh_f": u(lk[1], (4 * hidden_dim, hidden_dim)).T,
            "b_f": (u(lk[2], (4 * hidden_dim,)) + u(lk[3], (4 * hidden_dim,)))[None, :],
            "wih_b": u(lk[4], (4 * hidden_dim, d_in)).T,
            "whh_b": u(lk[5], (4 * hidden_dim, hidden_dim)).T,
            "b_b": (u(lk[6], (4 * hidden_dim,)) + u(lk[7], (4 * hidden_dim,)))[None, :],
        }
        layers.append(layer)

    kf = 1.0 / jnp.sqrt(2 * hidden_dim)
    fc_w = jax.random.uniform(keys[1], (output_dim, 2 * hidden_dim),
                              jnp.float32, -kf, kf).T          # (2H, O)
    fc_b = jax.random.uniform(jax.random.fold_in(keys[1], 1), (output_dim,),
                              jnp.float32, -kf, kf)[None, :]   # (1, O)

    return {"embedding": emb, "layers": layers, "fc_w": fc_w, "fc_b": fc_b}


# ----------------------------- pure-JAX reference ------------------------------

def _reference_forward(token_ids, params):
    emb = jnp.take(params["embedding"], token_ids, axis=0)
    x = emb.astype(jnp.float32)          # (B, T, D)
    for layer in params["layers"]:
        H = layer["whh_f"].shape[0]
        B, T, _ = x.shape

        def run(wih, whh, b, reverse):
            def step(carry, x_t):
                h, c = carry
                gates = x_t @ wih + h @ whh + b
                i = jax.nn.sigmoid(gates[:, 0:H])
                f = jax.nn.sigmoid(gates[:, H:2 * H])
                g = jnp.tanh(gates[:, 2 * H:3 * H])
                o = jax.nn.sigmoid(gates[:, 3 * H:4 * H])
                c = f * c + i * g
                h = o * jnp.tanh(c)
                return (h, c), h
            xs = jnp.transpose(x, (1, 0, 2))
            init = (jnp.zeros((B, H), jnp.float32), jnp.zeros((B, H), jnp.float32))
            _, hs = lax.scan(step, init, xs, reverse=reverse)
            return jnp.transpose(hs, (1, 0, 2))

        out_f = run(layer["wih_f"], layer["whh_f"], layer["b_f"], False)
        out_b = run(layer["wih_b"], layer["whh_b"], layer["b_b"], True)
        x = jnp.concatenate([out_f, out_b], axis=-1)
    logits = x @ params["fc_w"] + params["fc_b"]
    return jax.nn.log_softmax(logits, axis=-1)


# ---------------------------------- main ---------------------------------------

if __name__ == "__main__":
    VOCAB = 50
    EMBED_DIM = 64
    HIDDEN_DIM = 32
    NUM_LAYERS = 2
    OUTPUT_DIM = 9
    BATCH = 2
    SEQ = 8

    root = jax.random.PRNGKey(0)
    k_params, k_tokens = jax.random.split(root)

    params = init_params(k_params, VOCAB, EMBED_DIM, HIDDEN_DIM,
                         NUM_LAYERS, OUTPUT_DIM)
    token_ids = jax.random.randint(k_tokens, (BATCH, SEQ), 0, VOCAB, jnp.int32)

    out = jax.jit(bilstm_ner_forward)(token_ids, params)
    out = jax.block_until_ready(out)

    ref = jax.block_until_ready(_reference_forward(token_ids, params))
    assert out.shape == (BATCH, SEQ, OUTPUT_DIM)
    assert bool(jnp.isfinite(out).all()), "non-finite outputs"
    assert jnp.allclose(out, ref, atol=1e-3, rtol=1e-3), "mismatch vs reference"

    print("KERNEL_OK")
</pallas_src>

<mosaic_0001>
module attributes {stable_mosaic.version = 11 : i64} {
  func.func @kernel(%arg0: memref<64x64xf32, #tpu.memory_space<vmem>>, %arg1: memref<64x256xf32, #tpu.memory_space<vmem>>, %arg2: memref<32x128xf32, #tpu.memory_space<vmem>>, %arg3: memref<32x128xf32, #tpu.memory_space<vmem>>, %arg4: memref<1x256xf32, #tpu.memory_space<vmem>>, %arg5: memref<64x256xf32, #tpu.memory_space<vmem>>, %arg6: memref<32x128xf32, #tpu.memory_space<vmem>>, %arg7: memref<32x128xf32, #tpu.memory_space<vmem>>, %arg8: memref<1x256xf32, #tpu.memory_space<vmem>>, %arg9: memref<64x128xf32, #tpu.memory_space<vmem>>, %arg10: memref<1x128xf32, #tpu.memory_space<vmem>>, %arg11: memref<64x128xf32, #tpu.memory_space<vmem>>, %arg12: memref<64x64xf32, #tpu.memory_space<vmem>>, %arg13: memref<64x64xf32, #tpu.memory_space<vmem>>, %arg14: memref<64x256xf32, #tpu.memory_space<vmem>>) attributes {dimension_semantics = [], scalar_prefetch = 0 : i64, scratch_operands = 3 : i64, tpu.core_type = #tpu.core_type<tc>} {
    %c0 = arith.constant 0 : index
    %c0_0 = arith.constant 0 : index
    %0 = vector.load %arg0[%c0, %c0_0] : memref<64x64xf32, #tpu.memory_space<vmem>>, vector<64x64xf32>
    %c0_1 = arith.constant 0 : index
    %c0_2 = arith.constant 0 : index
    %1 = vector.load %arg1[%c0_1, %c0_2] : memref<64x256xf32, #tpu.memory_space<vmem>>, vector<64x256xf32>
    %cst = arith.constant dense<0.000000e+00> : vector<64x256xf32>
    %2 = tpu.matmul %0, %1, %cst {dimension_numbers = #tpu.dot_dimension_numbers<[1], [0], [0], [1], [0, 0, 1, 1], [], []>} : vector<64x64xf32>, vector<64x256xf32>, vector<64x256xf32> -> vector<64x256xf32>
    %c0_3 = arith.constant 0 : index
    %c0_4 = arith.constant 0 : index
    %3 = vector.load %arg4[%c0_3, %c0_4] : memref<1x256xf32, #tpu.memory_space<vmem>>, vector<1x256xf32>
    %4 = vector.broadcast %3 : vector<1x256xf32> to vector<64x256xf32>
    %5 = arith.addf %2, %4 : vector<64x256xf32>
    %c0_5 = arith.constant 0 : index
    %c0_6 = arith.constant 0 : index
    %6 = vector.load %arg14[%c0_5, %c0_6] : memref<64x256xf32, #tpu.memory_space<vmem>>, vector<64x256xf32>
    tpu.vector_store %arg14[%c0_5, %c0_6], %5 {strides = array<i32>} : memref<64x256xf32, #tpu.memory_space<vmem>>, vector<64x256xf32>,
    %c0_7 = arith.constant 0 : index
    %c0_8 = arith.constant 0 : index
    %7 = vector.load %arg2[%c0_7, %c0_8] : memref<32x128xf32, #tpu.memory_space<vmem>>, vector<32x128xf32>
    %c0_9 = arith.constant 0 : index
    %c0_10 = arith.constant 0 : index
    %8 = vector.load %arg3[%c0_9, %c0_10] : memref<32x128xf32, #tpu.memory_space<vmem>>, vector<32x128xf32>
    %cst_11 = arith.constant 0.000000e+00 : f32
    %9 = vector.broadcast %cst_11 : f32 to vector<8x32xf32>
    %c0_i32 = arith.constant 0 : i32
    %c8_i32 = arith.constant 8 : i32
    %10 = arith.addi %c0_i32, %c8_i32 : i32
    %c1_i32 = arith.constant 1 : i32
    %11:4 = scf.for %arg15 = %c0_i32 to %10 step %c1_i32 iter_args(%arg16 = %9, %arg17 = %9, %arg18 = %9, %arg19 = %9) -> (vector<8x32xf32>, vector<8x32xf32>, vector<8x32xf32>, vector<8x32xf32>)  : i32 {
      %c8_i32_42 = arith.constant 8 : i32
      %41 = arith.muli %arg15, %c8_i32_42 : i32
      %42 = tpu.assume_multiple %41, 8 : i32
      %c7_i32 = arith.constant 7 : i32
      %43 = arith.subi %c7_i32, %arg15 : i32
      %c8_i32_43 = arith.constant 8 : i32
      %44 = arith.muli %43, %c8_i32_43 : i32
      %45 = tpu.assume_multiple %44, 8 : i32
      %46 = arith.index_cast %42 : i32 to index
      %c0_44 = arith.constant 0 : index
      %47 = vector.load %arg14[%46, %c0_44] : memref<64x256xf32, #tpu.memory_space<vmem>>, vector<8x128xf32>
      %cst_45 = arith.constant dense<0.000000e+00> : vector<8x128xf32>
      %48 = tpu.matmul %arg16, %7, %cst_45 {dimension_numbers = #tpu.dot_dimension_numbers<[1], [0], [0], [1], [0, 0, 1, 1], [], []>} : vector<8x32xf32>, vector<32x128xf32>, vector<8x128xf32> -> vector<8x128xf32>
      %49 = arith.addf %47, %48 : vector<8x128xf32>
      %50 = arith.index_cast %45 : i32 to index
      %c128 = arith.constant 128 : index
      %51 = vector.load %arg14[%50, %c128] : memref<64x256xf32, #tpu.memory_space<vmem>>, vector<8x128xf32>
      %cst_46 = arith.constant dense<0.000000e+00> : vector<8x128xf32>
      %52 = tpu.matmul %arg18, %8, %cst_46 {dimension_numbers = #tpu.dot_dimension_numbers<[1], [0], [0], [1], [0, 0, 1, 1], [], []>} : vector<8x32xf32>, vector<32x128xf32>, vector<8x128xf32> -> vector<8x128xf32>
      %53 = arith.addf %51, %52 : vector<8x128xf32>
      %54 = vector.extract_strided_slice %49 {offsets = [0, 0], sizes = [8, 32], strides = [1, 1]} : vector<8x128xf32> to vector<8x32xf32>
      %55 = arith.negf %54 : vector<8x32xf32>
      %56 = math.exp %55 : vector<8x32xf32>
      %cst_47 = arith.constant 1.000000e+00 : f32
      %57 = vector.broadcast %cst_47 : f32 to vector<8x32xf32>
      %58 = arith.addf %57, %56 : vector<8x32xf32>
      %59 = arith.divf %57, %58 : vector<8x32xf32>
      %60 = vector.extract_strided_slice %49 {offsets = [0, 32], sizes = [8, 32], strides = [1, 1]} : vector<8x128xf32> to vector<8x32xf32>
      %61 = arith.negf %60 : vector<8x32xf32>
      %62 = math.exp %61 : vector<8x32xf32>
      %cst_48 = arith.constant 1.000000e+00 : f32
      %63 = vector.broadcast %cst_48 : f32 to vector<8x32xf32>
      %64 = arith.addf %63, %62 : vector<8x32xf32>
      %65 = arith.divf %63, %64 : vector<8x32xf32>
      %66 = vector.extract_strided_slice %49 {offsets = [0, 64], sizes = [8, 32], strides = [1, 1]} : vector<8x128xf32> to vector<8x32xf32>
      %67 = math.tanh %66 : vector<8x32xf32>
      %68 = vector.extract_strided_slice %49 {offsets = [0, 96], sizes = [8, 32], strides = [1, 1]} : vector<8x128xf32> to vector<8x32xf32>
      %69 = arith.negf %68 : vector<8x32xf32>
      %70 = math.exp %69 : vector<8x32xf32>
      %cst_49 = arith.constant 1.000000e+00 : f32
      %71 = vector.broadcast %cst_49 : f32 to vector<8x32xf32>
      %72 = arith.addf %71, %70 : vector<8x32xf32>
      %73 = arith.divf %71, %72 : vector<8x32xf32>
      %74 = arith.mulf %65, %arg17 : vector<8x32xf32>
      %75 = arith.mulf %59, %67 : vector<8x32xf32>
      %76 = arith.addf %74, %75 : vector<8x32xf32>
      %77 = math.tanh %76 : vector<8x32xf32>
      %78 = arith.mulf %73, %77 : vector<8x32xf32>
      %79 = vector.extract_strided_slice %53 {offsets = [0, 0], sizes = [8, 32], strides = [1, 1]} : vector<8x128xf32> to vector<8x32xf32>
      %80 = arith.negf %79 : vector<8x32xf32>
      %81 = math.exp %80 : vector<8x32xf32>
      %cst_50 = arith.constant 1.000000e+00 : f32
      %82 = vector.broadcast %cst_50 : f32 to vector<8x32xf32>
      %83 = arith.addf %82, %81 : vector<8x32xf32>
      %84 = arith.divf %82, %83 : vector<8x32xf32>
      %85 = vector.extract_strided_slice %53 {offsets = [0, 32], sizes = [8, 32], strides = [1, 1]} : vector<8x128xf32> to vector<8x32xf32>
      %86 = arith.negf %85 : vector<8x32xf32>
      %87 = math.exp %86 : vector<8x32xf32>
      %cst_51 = arith.constant 1.000000e+00 : f32
      %88 = vector.broadcast %cst_51 : f32 to vector<8x32xf32>
      %89 = arith.addf %88, %87 : vector<8x32xf32>
      %90 = arith.divf %88, %89 : vector<8x32xf32>
      %91 = vector.extract_strided_slice %53 {offsets = [0, 64], sizes = [8, 32], strides = [1, 1]} : vector<8x128xf32> to vector<8x32xf32>
      %92 = math.tanh %91 : vector<8x32xf32>
      %93 = vector.extract_strided_slice %53 {offsets = [0, 96], sizes = [8, 32], strides = [1, 1]} : vector<8x128xf32> to vector<8x32xf32>
      %94 = arith.negf %93 : vector<8x32xf32>
      %95 = math.exp %94 : vector<8x32xf32>
      %cst_52 = arith.constant 1.000000e+00 : f32
      %96 = vector.broadcast %cst_52 : f32 to vector<8x32xf32>
      %97 = arith.addf %96, %95 : vector<8x32xf32>
      %98 = arith.divf %96, %97 : vector<8x32xf32>
      %99 = arith.mulf %90, %arg19 : vector<8x32xf32>
      %100 = arith.mulf %84, %92 : vector<8x32xf32>
      %101 = arith.addf %99, %100 : vector<8x32xf32>
      %102 = math.tanh %101 : vector<8x32xf32>
      %103 = arith.mulf %98, %102 : vector<8x32xf32>
      %104 = arith.index_cast %42 : i32 to index
      %c0_53 = arith.constant 0 : index
      %105 = vector.load %arg12[%104, %c0_53] : memref<64x64xf32, #tpu.memory_space<vmem>>, vector<8x32xf32>
      tpu.vector_store %arg12[%104, %c0_53], %78 {strides = array<i32>} : memref<64x64xf32, #tpu.memory_space<vmem>>, vector<8x32xf32>,
      %106 = arith.index_cast %45 : i32 to index
      %c32 = arith.constant 32 : index
      %107 = vector.load %arg12[%106, %c32] : memref<64x64xf32, #tpu.memory_space<vmem>>, vector<8x32xf32>
      tpu.vector_store %arg12[%106, %c32], %103 {strides = array<i32>} : memref<64x64xf32, #tpu.memory_space<vmem>>, vector<8x32xf32>,
      scf.yield %78, %76, %103, %101 : vector<8x32xf32>, vector<8x32xf32>, vector<8x32xf32>, vector<8x32xf32>
    }
    %c8_i32_12 = arith.constant 8 : i32
    %c0_13 = arith.constant 0 : index
    %c0_14 = arith.constant 0 : index
    %12 = vector.load %arg12[%c0_13, %c0_14] : memref<64x64xf32, #tpu.memory_space<vmem>>, vector<64x64xf32>
    %c0_15 = arith.constant 0 : index
    %c0_16 = arith.constant 0 : index
    %13 = vector.load %arg5[%c0_15, %c0_16] : memref<64x256xf32, #tpu.memory_space<vmem>>, vector<64x256xf32>
    %cst_17 = arith.constant dense<0.000000e+00> : vector<64x256xf32>
    %14 = tpu.matmul %12, %13, %cst_17 {dimension_numbers = #tpu.dot_dimension_numbers<[1], [0], [0], [1], [0, 0, 1, 1], [], []>} : vector<64x64xf32>, vector<64x256xf32>, vector<64x256xf32> -> vector<64x256xf32>
    %c0_18 = arith.constant 0 : index
    %c0_19 = arith.constant 0 : index
    %15 = vector.load %arg8[%c0_18, %c0_19] : memref<1x256xf32, #tpu.memory_space<vmem>>, vector<1x256xf32>
    %16 = vector.broadcast %15 : vector<1x256xf32> to vector<64x256xf32>
    %17 = arith.addf %14, %16 : vector<64x256xf32>
    %c0_20 = arith.constant 0 : index
    %c0_21 = arith.constant 0 : index
    %18 = vector.load %arg14[%c0_20, %c0_21] : memref<64x256xf32, #tpu.memory_space<vmem>>, vector<64x256xf32>
    tpu.vector_store %arg14[%c0_20, %c0_21], %17 {strides = array<i32>} : memref<64x256xf32, #tpu.memory_space<vmem>>, vector<64x256xf32>,
    %c0_22 = arith.constant 0 : index
    %c0_23 = arith.constant 0 : index
    %19 = vector.load %arg6[%c0_22, %c0_23] : memref<32x128xf32, #tpu.memory_space<vmem>>, vector<32x128xf32>
    %c0_24 = arith.constant 0 : index
    %c0_25 = arith.constant 0 : index
    %20 = vector.load %arg7[%c0_24, %c0_25] : memref<32x128xf32, #tpu.memory_space<vmem>>, vector<32x128xf32>
    %cst_26 = arith.constant 0.000000e+00 : f32
    %21 = vector.broadcast %cst_26 : f32 to vector<8x32xf32>
    %c0_i32_27 = arith.constant 0 : i32
    %c8_i32_28 = arith.constant 8 : i32
    %22 = arith.addi %c0_i32_27, %c8_i32_28 : i32
    %c1_i32_29 = arith.constant 1 : i32
    %23:4 = scf.for %arg15 = %c0_i32_27 to %22 step %c1_i32_29 iter_args(%arg16 = %21, %arg17 = %21, %arg18 = %21, %arg19 = %21) -> (vector<8x32xf32>, vector<8x32xf32>, vector<8x32xf32>, vector<8x32xf32>)  : i32 {
      %c8_i32_42 = arith.constant 8 : i32
      %41 = arith.muli %arg15, %c8_i32_42 : i32
      %42 = tpu.assume_multiple %41, 8 : i32
      %c7_i32 = arith.constant 7 : i32
      %43 = arith.subi %c7_i32, %arg15 : i32
      %c8_i32_43 = arith.constant 8 : i32
      %44 = arith.muli %43, %c8_i32_43 : i32
      %45 = tpu.assume_multiple %44, 8 : i32
      %46 = arith.index_cast %42 : i32 to index
      %c0_44 = arith.constant 0 : index
      %47 = vector.load %arg14[%46, %c0_44] : memref<64x256xf32, #tpu.memory_space<vmem>>, vector<8x128xf32>
      %cst_45 = arith.constant dense<0.000000e+00> : vector<8x128xf32>
      %48 = tpu.matmul %arg16, %19, %cst_45 {dimension_numbers = #tpu.dot_dimension_numbers<[1], [0], [0], [1], [0, 0, 1, 1], [], []>} : vector<8x32xf32>, vector<32x128xf32>, vector<8x128xf32> -> vector<8x128xf32>
      %49 = arith.addf %47, %48 : vector<8x128xf32>
      %50 = arith.index_cast %45 : i32 to index
      %c128 = arith.constant 128 : index
      %51 = vector.load %arg14[%50, %c128] : memref<64x256xf32, #tpu.memory_space<vmem>>, vector<8x128xf32>
      %cst_46 = arith.constant dense<0.000000e+00> : vector<8x128xf32>
      %52 = tpu.matmul %arg18, %20, %cst_46 {dimension_numbers = #tpu.dot_dimension_numbers<[1], [0], [0], [1], [0, 0, 1, 1], [], []>} : vector<8x32xf32>, vector<32x128xf32>, vector<8x128xf32> -> vector<8x128xf32>
      %53 = arith.addf %51, %52 : vector<8x128xf32>
      %54 = vector.extract_strided_slice %49 {offsets = [0, 0], sizes = [8, 32], strides = [1, 1]} : vector<8x128xf32> to vector<8x32xf32>
      %55 = arith.negf %54 : vector<8x32xf32>
      %56 = math.exp %55 : vector<8x32xf32>
      %cst_47 = arith.constant 1.000000e+00 : f32
      %57 = vector.broadcast %cst_47 : f32 to vector<8x32xf32>
      %58 = arith.addf %57, %56 : vector<8x32xf32>
      %59 = arith.divf %57, %58 : vector<8x32xf32>
      %60 = vector.extract_strided_slice %49 {offsets = [0, 32], sizes = [8, 32], strides = [1, 1]} : vector<8x128xf32> to vector<8x32xf32>
      %61 = arith.negf %60 : vector<8x32xf32>
      %62 = math.exp %61 : vector<8x32xf32>
      %cst_48 = arith.constant 1.000000e+00 : f32
      %63 = vector.broadcast %cst_48 : f32 to vector<8x32xf32>
      %64 = arith.addf %63, %62 : vector<8x32xf32>
      %65 = arith.divf %63, %64 : vector<8x32xf32>
      %66 = vector.extract_strided_slice %49 {offsets = [0, 64], sizes = [8, 32], strides = [1, 1]} : vector<8x128xf32> to vector<8x32xf32>
      %67 = math.tanh %66 : vector<8x32xf32>
      %68 = vector.extract_strided_slice %49 {offsets = [0, 96], sizes = [8, 32], strides = [1, 1]} : vector<8x128xf32> to vector<8x32xf32>
      %69 = arith.negf %68 : vector<8x32xf32>
      %70 = math.exp %69 : vector<8x32xf32>
      %cst_49 = arith.constant 1.000000e+00 : f32
      %71 = vector.broadcast %cst_49 : f32 to vector<8x32xf32>
      %72 = arith.addf %71, %70 : vector<8x32xf32>
      %73 = arith.divf %71, %72 : vector<8x32xf32>
      %74 = arith.mulf %65, %arg17 : vector<8x32xf32>
      %75 = arith.mulf %59, %67 : vector<8x32xf32>
      %76 = arith.addf %74, %75 : vector<8x32xf32>
      %77 = math.tanh %76 : vector<8x32xf32>
      %78 = arith.mulf %73, %77 : vector<8x32xf32>
      %79 = vector.extract_strided_slice %53 {offsets = [0, 0], sizes = [8, 32], strides = [1, 1]} : vector<8x128xf32> to vector<8x32xf32>
      %80 = arith.negf %79 : vector<8x32xf32>
      %81 = math.exp %80 : vector<8x32xf32>
      %cst_50 = arith.constant 1.000000e+00 : f32
      %82 = vector.broadcast %cst_50 : f32 to vector<8x32xf32>
      %83 = arith.addf %82, %81 : vector<8x32xf32>
      %84 = arith.divf %82, %83 : vector<8x32xf32>
      %85 = vector.extract_strided_slice %53 {offsets = [0, 32], sizes = [8, 32], strides = [1, 1]} : vector<8x128xf32> to vector<8x32xf32>
      %86 = arith.negf %85 : vector<8x32xf32>
      %87 = math.exp %86 : vector<8x32xf32>
      %cst_51 = arith.constant 1.000000e+00 : f32
      %88 = vector.broadcast %cst_51 : f32 to vector<8x32xf32>
      %89 = arith.addf %88, %87 : vector<8x32xf32>
      %90 = arith.divf %88, %89 : vector<8x32xf32>
      %91 = vector.extract_strided_slice %53 {offsets = [0, 64], sizes = [8, 32], strides = [1, 1]} : vector<8x128xf32> to vector<8x32xf32>
      %92 = math.tanh %91 : vector<8x32xf32>
      %93 = vector.extract_strided_slice %53 {offsets = [0, 96], sizes = [8, 32], strides = [1, 1]} : vector<8x128xf32> to vector<8x32xf32>
      %94 = arith.negf %93 : vector<8x32xf32>
      %95 = math.exp %94 : vector<8x32xf32>
      %cst_52 = arith.constant 1.000000e+00 : f32
      %96 = vector.broadcast %cst_52 : f32 to vector<8x32xf32>
      %97 = arith.addf %96, %95 : vector<8x32xf32>
      %98 = arith.divf %96, %97 : vector<8x32xf32>
      %99 = arith.mulf %90, %arg19 : vector<8x32xf32>
      %100 = arith.mulf %84, %92 : vector<8x32xf32>
      %101 = arith.addf %99, %100 : vector<8x32xf32>
      %102 = math.tanh %101 : vector<8x32xf32>
      %103 = arith.mulf %98, %102 : vector<8x32xf32>
      %104 = arith.index_cast %42 : i32 to index
      %c0_53 = arith.constant 0 : index
      %105 = vector.load %arg13[%104, %c0_53] : memref<64x64xf32, #tpu.memory_space<vmem>>, vector<8x32xf32>
      tpu.vector_store %arg13[%104, %c0_53], %78 {strides = array<i32>} : memref<64x64xf32, #tpu.memory_space<vmem>>, vector<8x32xf32>,
      %106 = arith.index_cast %45 : i32 to index
      %c32 = arith.constant 32 : index
      %107 = vector.load %arg13[%106, %c32] : memref<64x64xf32, #tpu.memory_space<vmem>>, vector<8x32xf32>
      tpu.vector_store %arg13[%106, %c32], %103 {strides = array<i32>} : memref<64x64xf32, #tpu.memory_space<vmem>>, vector<8x32xf32>,
      scf.yield %78, %76, %103, %101 : vector<8x32xf32>, vector<8x32xf32>, vector<8x32xf32>, vector<8x32xf32>
    }
    %c8_i32_30 = arith.constant 8 : i32
    %c0_31 = arith.constant 0 : index
    %c0_32 = arith.constant 0 : index
    %24 = vector.load %arg13[%c0_31, %c0_32] : memref<64x64xf32, #tpu.memory_space<vmem>>, vector<64x64xf32>
    %c0_33 = arith.constant 0 : index
    %c0_34 = arith.constant 0 : index
    %25 = vector.load %arg9[%c0_33, %c0_34] : memref<64x128xf32, #tpu.memory_space<vmem>>, vector<64x128xf32>
    %cst_35 = arith.constant dense<0.000000e+00> : vector<64x128xf32>
    %26 = tpu.matmul %24, %25, %cst_35 {dimension_numbers = #tpu.dot_dimension_numbers<[1], [0], [0], [1], [0, 0, 1, 1], [], []>} : vector<64x64xf32>, vector<64x128xf32>, vector<64x128xf32> -> vector<64x128xf32>
    %c0_36 = arith.constant 0 : index
    %c0_37 = arith.constant 0 : index
    %27 = vector.load %arg10[%c0_36, %c0_37] : memref<1x128xf32, #tpu.memory_space<vmem>>, vector<1x128xf32>
    %28 = vector.broadcast %27 : vector<1x128xf32> to vector<64x128xf32>
    %29 = arith.addf %26, %28 : vector<64x128xf32>
    %cst_38 = arith.constant dense<0xFF800000> : vector<64xf32>
    %30 = vector.multi_reduction <maximumf>, %29, %cst_38 [1] : vector<64x128xf32> to vector<64xf32>
    %31 = vector.shape_cast %30 : vector<64xf32> to vector<64x1xf32>
    %32 = vector.broadcast %31 : vector<64x1xf32> to vector<64x128xf32>
    %33 = arith.subf %29, %32 : vector<64x128xf32>
    %34 = math.exp %33 : vector<64x128xf32>
    %cst_39 = arith.constant dense<0.000000e+00> : vector<64xf32>
    %35 = vector.multi_reduction <add>, %34, %cst_39 [1] : vector<64x128xf32> to vector<64xf32>
    %36 = vector.shape_cast %35 : vector<64xf32> to vector<64x1xf32>
    %37 = math.log %36 : vector<64x1xf32>
    %38 = vector.broadcast %37 : vector<64x1xf32> to vector<64x128xf32>
    %39 = arith.subf %33, %38 : vector<64x128xf32>
    %c0_40 = arith.constant 0 : index
    %c0_41 = arith.constant 0 : index
    %40 = vector.load %arg11[%c0_40, %c0_41] : memref<64x128xf32, #tpu.memory_space<vmem>>, vector<64x128xf32>
    tpu.vector_store %arg11[%c0_40, %c0_41], %39 {strides = array<i32>} : memref<64x128xf32, #tpu.memory_space<vmem>>, vector<64x128xf32>,
    return
  }
}

</mosaic_0001>

<bundles_post_ra>
// kernel: bilstm_ner_forward.1
= control target key start
LH: loop header
LB: loop body
LE: loop exit
PB: predicated region body
PF: predicated region fallthrough
CT: control target
= control target key end

     0   :  { %v1693_v3 = vmov 0.0   ;;  %vm74_vm0 = vcmask 523264   ;;  %v64_v41 = vlaneseq  ;;  %s2237_s1 = inlined_call_operand.vmem [shape: f32[64,256], index: 1, kind: input, shape index: {}]   ;;  %s2238_s5 = inlined_call_operand.vmem [shape: f32[64,256], index: 5, kind: input, shape index: {}]   ;;  %s2239_s6 = inlined_call_operand.vmem [shape: f32[32,128], index: 6, kind: input, shape index: {}]   ;;  %s2240_s7 = inlined_call_operand.vmem [shape: f32[32,128], index: 7, kind: input, shape index: {}]   ;;  %s2241_s8 = inlined_call_operand.vmem [shape: f32[1,256], index: 8, kind: input, shape index: {}]   ;;  %s2242_s9 = inlined_call_operand.vmem [shape: f32[64,128], index: 9, kind: input, shape index: {}]   ;;  %s2243_s10 = inlined_call_operand.vmem [shape: f32[1,128], index: 10, kind: input, shape index: {}]   ;;  %s2244_s11 = inlined_call_operand.vmem [shape: f32[64,128], index: 11, kind: output, shape index: {}]   ;;  %s2245_s0 = inlined_call_operand.vmem [shape: f32[64,64], index: 0, kind: input, shape index: {}]   ;;  %s2246_s2 = inlined_call_operand.vmem [shape: f32[32,128], index: 2, kind: input, shape index: {}]   ;;  %s2247_s3 = inlined_call_operand.vmem [shape: f32[32,128], index: 3, kind: input, shape index: {}]   ;;  %s2248_s4 = inlined_call_operand.vmem [shape: f32[1,256], index: 4, kind: input, shape index: {}]  }
   0x1   :  { %v47_v0 = vld [vmem:[%s2237_s1 + $0x8] sm:$0xff]  ;;  %v49_v1 = vld [vmem:[%s2237_s1 + $0x18] sm:$0xff]  ;;  %v46_v2 = vld [vmem:[%s2237_s1] sm:$0xff]  ;;  %163 = vmatprep.mubr.f32.mxu0 %v1693_v3  ;;  %187 = vmatprep.mubr.f32.mxu1 %v1693_v3 }
   0x2   :  { %v1362_v4 = vpack.c.bf16 %v49_v1, %v47_v0  ;;  %v48_v5 = vld [vmem:[%s2237_s1 + $0x10] sm:$0xff]  ;;  %v51_v6 = vld [vmem:[%s2237_s1 + $0x28] sm:$0xff]  ;;  %v53_v7 = vld [vmem:[%s2237_s1 + $0x38] sm:$0xff]  ;;  %v1892_v42 = vshrl.u32 %v64_v41, 7 }
   0x3   :  { %v1364_v8 = vpack.c.bf16 %v48_v5, %v46_v2  ;;  %v1366_v9 = vpack.c.bf16 %v53_v7, %v51_v6  ;;  %v50_v10 = vld [vmem:[%s2237_s1 + $0x20] sm:$0xff]  ;;  %v52_v11 = vld [vmem:[%s2237_s1 + $0x30] sm:$0xff]  ;;  %v55_v12 = vld [vmem:[%s2237_s1 + $0x48] sm:$0xff] }
   0x4   :  { %1363 = vmatprep.subr.bf16.mxu0 %v1362_v4  ;;  %1434 = vmatprep.subr.bf16.mxu1 %v1362_v4  ;;  %v57_v13 = vld [vmem:[%s2237_s1 + $0x58] sm:$0xff]  ;;  %v1368_v14 = vpack.c.bf16 %v52_v11, %v50_v10  ;;  %v54_v16 = vld [vmem:[%s2237_s1 + $0x40] sm:$0xff]  ;;  %v56_v17 = vld [vmem:[%s2237_s1 + $0x50] sm:$0xff]  ;;  %v66_v43 = vsub.s32 0, %v1892_v42  ;;  %v70_v45 = vsub.s32 1, %v1892_v42 }
   0x5   :  { %1365 = vmatpush1.bf16.msra.mxu0 %v1364_v8  ;;  %1438 = vmatpush1.bf16.msra.mxu1 %v1364_v8  ;;  %v1370_v15 = vpack.c.bf16 %v57_v13, %v55_v12  ;;  %v59_v18 = vld [vmem:[%s2237_s1 + $0x68] sm:$0xff]  ;;  %v61_v19 = vld [vmem:[%s2237_s1 + $0x78] sm:$0xff]  ;;  %v1372_v20 = vpack.c.bf16 %v56_v17, %v54_v16  ;;  %v58_v22 = vld [vmem:[%s2237_s1 + $0x60] sm:$0xff]  ;;  %v1903_v17 = vmov 0.0  }
   0x6   :  { %1367 = vmatprep.subr.bf16.mxu0 %v1366_v9  ;;  %1435 = vmatprep.subr.bf16.mxu1 %v1366_v9  ;;  %v1374_v21 = vpack.c.bf16 %v61_v19, %v59_v18  ;;  %v60_v23 = vld [vmem:[%s2237_s1 + $0x70] sm:$0xff]  ;;  %v38_v25 = vld [vmem:[%s2245_s0] sm:$0xff]  ;;  %v39_v27 = vld [vmem:[%s2245_s0 + $0x8] sm:$0xff]  ;;  %v1905_v18 = vmov 0.0   ;;  %v1907_v19 = vmov 0.0  }
   0x7   :  { %v1376_v24 = vpack.c.bf16 %v60_v23, %v58_v22  ;;  %v42_v26 = vld [vmem:[%s2245_s0 + $0x20] sm:$0xff]  ;;  %v43_v28 = vld [vmem:[%s2245_s0 + $0x28] sm:$0xff]  ;;  %v40_v29 = vld [vmem:[%s2245_s0 + $0x10] sm:$0xff] }
   0x8   :  { %v44_v30 = vld [vmem:[%s2245_s0 + $0x30] sm:$0xff]  ;;  %v41_v31 = vld [vmem:[%s2245_s0 + $0x18] sm:$0xff]  ;;  %v1855_v33 = vld [vmem:[%s2246_s2] sm:$0xff] }
   0x9   :  { %1369 = vmatpush1.bf16.msra.mxu0 %v1368_v14  ;;  %1439 = vmatpush1.bf16.msra.mxu1 %v1368_v14  ;;  %v45_v32 = vld [vmem:[%s2245_s0 + $0x38] sm:$0xff]  ;;  %v1860_v34 = vld [vmem:[%s2246_s2 + $0x8] sm:$0xff]  ;;  %v1865_v35 = vld [vmem:[%s2246_s2 + $0x10] sm:$0xff] }
   0xa   :  { %1371 = vmatprep.subr.bf16.mxu0 %v1370_v15  ;;  %1436 = vmatprep.subr.bf16.mxu1 %v1370_v15  ;;  %v1870_v36 = vld [vmem:[%s2246_s2 + $0x18] sm:$0xff]  ;;  %v1875_v37 = vld [vmem:[%s2247_s3] sm:$0xff]  ;;  %v1880_v38 = vld [vmem:[%s2247_s3 + $0x8] sm:$0xff] }
   0xb   :  { %v1885_v39 = vld [vmem:[%s2247_s3 + $0x10] sm:$0xff]  ;;  %v1890_v40 = vld [vmem:[%s2247_s3 + $0x18] sm:$0xff]  ;;  %v62_v44 = vld [vmem:[%s2248_s4] sm:$0x3]  ;;  %s1911_s3 = smov 0  }
   0xc   :  { %v67_v46 = vrot.slane %v62_v44, %v66_v43  ;;  %v71_v47 = vrot.slane %v62_v44, %v70_v45 }
   0xd   :  { %1373 = vmatpush1.bf16.msra.mxu0 %v1372_v20  ;;  %1440 = vmatpush1.bf16.msra.mxu1 %v1372_v20  ;;  %v1909_v20 = vmov 0.0  }
   0xe   :  { %1375 = vmatprep.subr.bf16.mxu0 %v1374_v21  ;;  %1437 = vmatprep.subr.bf16.mxu1 %v1374_v21 }
  0x11   :  { %1377 = vmatpush1.bf16.msra.mxu0 %v1376_v24  ;;  %1441 = vmatpush1.bf16.msra.mxu1 %v1376_v24 }
  0x14   :  { %1205 = vmatmul.mubr.msk.f32.vlgmr.msra.gmra.mrb[0].mxu0 %vm74_vm0, %v38_v25  ;;  %1209 = vmatmul.mubr.msk.f32.vlgmr.msra.gmra.mrb[0].mxu1 %vm74_vm0, %v42_v26 }
  0x15   :  { %169 = vmatprep.mubr.f32.mxu0 %v1693_v3  ;;  %193 = vmatprep.mubr.f32.mxu1 %v1693_v3 }
  0x18   :  { %1206 = vmatmul.mubr.msk.f32.gmra.mrb[2].mxu0 %vm74_vm0, %v39_v27  ;;  %1210 = vmatmul.mubr.msk.f32.gmra.mrb[2].mxu1 %vm74_vm0, %v43_v28 }
  0x19   :  { %175 = vmatprep.mubr.f32.mxu0 %v1693_v3  ;;  %199 = vmatprep.mubr.f32.mxu1 %v1693_v3 }
  0x1c   :  { %1207 = vmatmul.mubr.msk.f32.gmra.mrb[4].mxu0 %vm74_vm0, %v40_v29  ;;  %1211 = vmatmul.mubr.msk.f32.gmra.mrb[4].mxu1 %vm74_vm0, %v44_v30 }
  0x1d   :  { %181 = vmatprep.mubr.f32.mxu0 %v1693_v3  ;;  %205 = vmatprep.mubr.f32.mxu1 %v1693_v3 }
  0x20   :  { %1208 = vmatmul.mubr.msk.f32.gmra.mrb[6].mxu0 %vm74_vm0, %v41_v31  ;;  %1212 = vmatmul.mubr.msk.f32.gmra.mrb[6].mxu1 %vm74_vm0, %v45_v32 }
  0xe7   :  { %v165_v48 = vpop.f32.mrb[0].mxu0  ;;  %v189_v49 = vpop.f32.mrb[0].mxu1 }
  0xe8   :  { %v166_v50 = vadd.f32 %v165_v48, %v67_v46  ;;  %v190_v51 = vadd.f32 %v189_v49, %v67_v46  ;;  %v167_v52 = vpop.f32.mrb[1].mxu0  ;;  %v191_v53 = vpop.f32.mrb[1].mxu1 }
  0xe9   :  { %v168_v54 = vadd.f32 %v167_v52, %v71_v47  ;;  %v192_v55 = vadd.f32 %v191_v53, %v71_v47 }
  0xea   :  { %212 = vst [vmem:[#allocation4] sm:$0xff] %v166_v50  ;;  %220 = vst [vmem:[#allocation4 + $0x40] sm:$0xff] %v190_v51 }
  0xeb   :  { %213 = vst [vmem:[#allocation4 + $0x8] sm:$0xff] %v168_v54  ;;  %221 = vst [vmem:[#allocation4 + $0x48] sm:$0xff] %v192_v55  ;;  %v171_v56 = vpop.f32.mrb[2].mxu0  ;;  %v195_v57 = vpop.f32.mrb[2].mxu1 }
  0xec   :  { %v172_v58 = vadd.f32 %v171_v56, %v67_v46  ;;  %v196_v59 = vadd.f32 %v195_v57, %v67_v46  ;;  %v173_v60 = vpop.f32.mrb[3].mxu0  ;;  %v197_v61 = vpop.f32.mrb[3].mxu1 }
  0xed   :  { %v174_v62 = vadd.f32 %v173_v60, %v71_v47  ;;  %v198_v63 = vadd.f32 %v197_v61, %v71_v47 }
  0xee   :  { %214 = vst [vmem:[#allocation4 + $0x10] sm:$0xff] %v172_v58  ;;  %222 = vst [vmem:[#allocation4 + $0x50] sm:$0xff] %v196_v59 }
  0xef   :  { %215 = vst [vmem:[#allocation4 + $0x18] sm:$0xff] %v174_v62  ;;  %223 = vst [vmem:[#allocation4 + $0x58] sm:$0xff] %v198_v63  ;;  %v177_v0 = vpop.f32.mrb[4].mxu0  ;;  %v201_v1 = vpop.f32.mrb[4].mxu1 }
  0xf0   :  { %v178_v2 = vadd.f32 %v177_v0, %v67_v46  ;;  %v202_v4 = vadd.f32 %v201_v1, %v67_v46  ;;  %v179_v5 = vpop.f32.mrb[5].mxu0  ;;  %v203_v6 = vpop.f32.mrb[5].mxu1 }
  0xf1   :  { %v180_v7 = vadd.f32 %v179_v5, %v71_v47  ;;  %v204_v8 = vadd.f32 %v203_v6, %v71_v47 }
  0xf2   :  { %216 = vst [vmem:[#allocation4 + $0x20] sm:$0xff] %v178_v2  ;;  %224 = vst [vmem:[#allocation4 + $0x60] sm:$0xff] %v202_v4 }
  0xf3   :  { %217 = vst [vmem:[#allocation4 + $0x28] sm:$0xff] %v180_v7  ;;  %225 = vst [vmem:[#allocation4 + $0x68] sm:$0xff] %v204_v8  ;;  %v183_v9 = vpop.f32.mrb[6].mxu0  ;;  %v207_v10 = vpop.f32.mrb[6].mxu1 }
  0xf4   :  { %v184_v11 = vadd.f32 %v183_v9, %v67_v46  ;;  %v208_v12 = vadd.f32 %v207_v10, %v67_v46  ;;  %v185_v13 = vpop.f32.mrb[7].mxu0  ;;  %v209_v14 = vpop.f32.mrb[7].mxu1 }
  0xf5   :  { %v186_v15 = vadd.f32 %v185_v13, %v71_v47  ;;  %v210_v16 = vadd.f32 %v209_v14, %v71_v47 }
  0xf6   :  { %218 = vst [vmem:[#allocation4 + $0x30] sm:$0xff] %v184_v11  ;;  %226 = vst [vmem:[#allocation4 + $0x70] sm:$0xff] %v208_v12 }
  0xf7   :  { %219 = vst [vmem:[#allocation4 + $0x38] sm:$0xff] %v186_v15  ;;  %227 = vst [vmem:[#allocation4 + $0x78] sm:$0xff] %v210_v16 }
  0xf8 LB: > { %v1379_v21 = vpack.c.bf16 %v1860_v34, %v1855_v33  ;;  %v1694_v22 = vmov 0.0|0.0   ;;  %v1385_v23 = vpack.c.bf16 %v1880_v38, %v1875_v37  ;;  %s1695_s4 = smov 32   ;;  %v1382_v24 = vpack.c.bf16 %v1870_v36, %v1865_v35  ;;  %s1213_s22 = sshll.u32 %s1671_s3, 3  ;;  %s1671_s3 = sphi %s1911_s3, %s241_s3   ;;  %v1667_v20 = vphi %v1909_v20, %v437_v20   ;;  %v1663_v19 = vphi %v1907_v19, %v431_v19   ;;  %v1659_v18 = vphi %v1905_v18, %v461_v18   ;;  %v1655_v17 = vphi %v1903_v17, %v455_v17  }
  0xf9   : > { %1378 = vmatprep.subr.bf16.mxu0 %v1694_v22  ;;  %1384 = vmatprep.subr.bf16.mxu1 %v1694_v22  ;;  %v1388_v25 = vpack.c.bf16 %v1890_v40, %v1885_v39  ;;  %vm1696_vm1 = vmmov 0   ;;  %v1697_v26 = vmov 0.0   ;;  %vm258_vm2 = vcmask 261120   ;;  %s247_s23 = ssub.s32 7, %s1671_s3  ;;  %s249_s24 = sshra.s32 %s1213_s22, 3 }
  0xfa   : > { %256 = vrot.lane.b32.xlu0 %v1667_v20, %s1695_s4  ;;  %1380 = vmatpush3.bf16.msra.mxu0 %v1379_v21  ;;  %s1940_s25 = sshll.u32 %s247_s23, 3  ;;  %s1250_s26 = sshll.u32 %s249_s24, 4  ;;  %vm473_vm3 = vcmask 523520  }
  0xfb   : > { %1381 = vmatprep.subr.bf16.mxu0 %v1694_v22  ;;  %1386 = vmatpush3.bf16.msra.mxu1 %v1385_v23  ;;  %s332_s27 = sshra.s32 %s1940_s25, 3  ;;  %s253_s29 = scalar_lea.vmem [#allocation4], %s1250_s26 }
  0xfc   : > { %1298 = vmatprep.mubr.msk.f32.mxu0 %vm1696_vm1, %v1697_v26  ;;  %1387 = vmatprep.subr.bf16.mxu1 %v1694_v22  ;;  %s1251_s28 = sshll.u32 %s332_s27, 4  ;;  %s1698_s12 = smov 64  }
  0xfd   : > { %1309 = vmatprep.mubr.msk.f32.mxu1 %vm1696_vm1, %v1697_v26  ;;  %s336_s30 = scalar_lea.vmem [#allocation4], %s1251_s28  ;;  %s466_s0 = scalar_lea.vmem [#allocation2], %s1213_s22 }
  0xfe   : > { %339 = vrot.lane.b32.xlu0 %v1659_v18, %s1695_s4  ;;  %1383 = vmatpush3.bf16.msra.mxu0 %v1382_v24  ;;  %v254_v29 = vld [vmem:[%s253_s29] sm:$0xff]  ;;  %v337_v41 = vld [vmem:[%s336_s30 + $0x8] sm:$0xff]  ;;  %s472_s13 = scalar_lea.vmem [#allocation2], %s1940_s25  ;;  %s241_s3 = sadd.s32 1, %s1671_s3  }
  0xff   : > { %1389 = vmatpush3.bf16.msra.mxu1 %v1388_v25  ;;  %p238_p0 = scmp.ge.s32.totalorder %s241_s3, 8  }
 0x100   :  { %v484_v9 = vld [vmem:[%s2238_s5 + $0x8] sm:$0xff] (%p238_p0)  ;;  %v486_v10 = vld [vmem:[%s2238_s5 + $0x18] sm:$0xff] (%p238_p0)  ;;  %v483_v11 = vld [vmem:[%s2238_s5] sm:$0xff] (%p238_p0) }
 0x101   :  { %v1390_v12 = vpack.c.bf16 (%p238_p0), %v486_v10, %v484_v9  ;;  %v485_v33 = vld [vmem:[%s2238_s5 + $0x10] sm:$0xff] (%p238_p0)  ;;  %v488_v34 = vld [vmem:[%s2238_s5 + $0x28] sm:$0xff] (%p238_p0)  ;;  %v490_v35 = vld [vmem:[%s2238_s5 + $0x38] sm:$0xff] (%p238_p0) }
 0x102   :  { %v1392_v36 = vpack.c.bf16 (%p238_p0), %v485_v33, %v483_v11  ;;  %v1394_v37 = vpack.c.bf16 (%p238_p0), %v490_v35, %v488_v34  ;;  %v487_v38 = vld [vmem:[%s2238_s5 + $0x20] sm:$0xff] (%p238_p0)  ;;  %v489_v39 = vld [vmem:[%s2238_s5 + $0x30] sm:$0xff] (%p238_p0)  ;;  %v492_v40 = vld [vmem:[%s2238_s5 + $0x48] sm:$0xff] (%p238_p0) }
 0x103   :  { %1391 = vmatprep.subr.bf16.mxu0 (%p238_p0), %v1390_v12  ;;  %1442 = vmatprep.subr.bf16.mxu1 (%p238_p0), %v1390_v12  ;;  %v494_v13 = vld [vmem:[%s2238_s5 + $0x58] sm:$0xff] (%p238_p0)  ;;  %v1396_v14 = vpack.c.bf16 (%p238_p0), %v489_v39, %v487_v38  ;;  %v491_v16 = vld [vmem:[%s2238_s5 + $0x40] sm:$0xff] (%p238_p0)  ;;  %v497_v23 = vld [vmem:[%s2238_s5 + $0x70] sm:$0xff] (%p238_p0) }
 0x104   :  { %v1398_v15 = vpack.c.bf16 (%p238_p0), %v494_v13, %v492_v40  ;;  %v495_v22 = vld [vmem:[%s2238_s5 + $0x60] sm:$0xff] (%p238_p0)  ;;  %v2080_v40 = vmov (%p238_p0), 0.0   ;;  %v2082_v13 = vmov (%p238_p0), 0.0  }
 0x105   :  { %v1404_v24 = vpack.c.bf16 (%p238_p0), %v497_v23, %v495_v22 }
 0x16c   : > { %v257_v27 = vpop.permute.xlu0 %256 }
 0x16d   : > { %1299 = vmatmul.mubr.msk.f32.vlgmr.msra.gmra.mrb[0].mxu0 %vm258_vm2, %v257_v27 }
 0x16e   :  { %599 = vmatprep.mubr.f32.mxu0 (%p238_p0), %v1693_v3  ;;  %1393 = vmatpush1.bf16.msra.mxu0 (%p238_p0), %v1392_v36 }
 0x16f   :  { %1395 = vmatprep.subr.bf16.mxu0 (%p238_p0), %v1394_v37 }
 0x170   : > { %v340_v28 = vpop.permute.xlu0 %339 }
 0x171   : > { %1310 = vmatmul.mubr.msk.f32.vlgmr.msra.gmra.mrb[0].mxu1 %vm258_vm2, %v340_v28 }
 0x172   :  { %623 = vmatprep.mubr.f32.mxu1 (%p238_p0), %v1693_v3  ;;  %1446 = vmatpush1.bf16.msra.mxu1 (%p238_p0), %v1392_v36 }
 0x173   :  { %1443 = vmatprep.subr.bf16.mxu1 (%p238_p0), %v1394_v37  ;;  %1397 = vmatpush1.bf16.msra.mxu0 (%p238_p0), %v1396_v14 }
 0x174   :  { %1399 = vmatprep.subr.bf16.mxu0 (%p238_p0), %v1398_v15 }
 0x176   :  { %1447 = vmatpush1.bf16.msra.mxu1 (%p238_p0), %v1396_v14  ;;  %v2084_v14 = vmov (%p238_p0), 0.0  }
 0x177   :  { %1444 = vmatprep.subr.bf16.mxu1 (%p238_p0), %v1398_v15  ;;  %v2086_v15 = vmov (%p238_p0), 0.0  }
 0x240   : > { %v327_v30 = vpop.f32.mrb[0].mxu0 }
 0x241   : > { %v331_v31 = vadd.f32 %v327_v30, %v254_v29  ;;  %v1300_v32 = vpop.f32.mrb[1].mxu0 }
 0x243   : > { %1549 = vtanh.f32 %v331_v31  ;;  %v1221_v50 = vmul.f32 -1.442695, %v331_v31 }
 0x244   : > { %v409_v44 = vpop.f32.mrb[0].mxu1 }
 0x245   : > { %v413_v46 = vadd.f32 %v409_v44, %v337_v41  ;;  %v1311_v47 = vpop.f32.mrb[1].mxu1  ;;  %v2036_v41 = vld [vmem:[%s2239_s6] sm:$0xff] (%p238_p0)  ;;  %v2041_v44 = vld [vmem:[%s2239_s6 + $0x8] sm:$0xff] (%p238_p0) }
 0x246   :  { %v2056_v47 = vld [vmem:[%s2240_s7] sm:$0xff] (%p238_p0) }
 0x247   : > { %1551 = vtanh.f32 %v413_v46  ;;  %v1222_v51 = vmul.f32 -1.442695, %v413_v46  ;;  %v2051_v46 = vld [vmem:[%s2239_s6 + $0x18] sm:$0xff] (%p238_p0) }
 0x248   : > { %1553 = vpow2.f32 %v1221_v50  ;;  %v2071_v50 = vld [vmem:[%s2240_s7 + $0x18] sm:$0xff] (%p238_p0) }
 0x249   : > { %1555 = vpow2.f32 %v1222_v51  ;;  %v499_v51 = vld [vmem:[%s2241_s8] sm:$0x3] (%p238_p0) }
 0x24d   : > { %v1550_v48 = vpop.eup %1549 }
 0x24e   : > { %423 = vrot.lane.b32.xlu1 %v1550_v48, %s1698_s12  ;;  %v2061_v48 = vld [vmem:[%s2240_s7 + $0x8] sm:$0xff] (%p238_p0) }
 0x251   : > { %v1552_v49 = vpop.eup %1551 }
 0x252   : > { %447 = vrot.lane.b32.xlu1 %v1552_v49, %s1698_s12  ;;  %v1554_v52 = vpop.eup %1553  ;;  %v2066_v49 = vld [vmem:[%s2240_s7 + $0x10] sm:$0xff] (%p238_p0)  ;;  %s2088_s7 = smov (%p238_p0), 0  }
 0x253   : > { %v417_v53 = vadd.f32 1.0, %v1554_v52  ;;  %v1556_v54 = vpop.eup %1555  ;;  %v504_v52 = vrot.slane (%p238_p0), %v499_v51, %v66_v43 }
 0x254   : > { %v441_v55 = vadd.f32 1.0, %v1556_v54 }
 0x255   : > { %1557 = vrcp.f32 %v417_v53  ;;  %v508_v53 = vrot.slane (%p238_p0), %v499_v51, %v70_v45 }
 0x256   : > { %1559 = vrcp.f32 %v441_v55 }
 0x25f   : > { %v1558_v56 = vpop.eup %1557 }
 0x260   : > { %v1560_v59 = vpop.eup %1559  ;;  %v421_v62 = vmul.f32 %v1663_v19, %v1558_v56 }
 0x261   : > { %v445_v0 = vmul.f32 %v1655_v17, %v1560_v59 }
 0x2c0   : > { %v424_v57 = vpop.permute.xlu1 %423 }
 0x2c1   : > { %v426_v58 = vmul.f32 %v1558_v56, %v424_v57 }
 0x2c3   : > { %428 = vrot.lane.b32.xlu0 %v426_v58, %s1695_s4 }
 0x2c4   : > { %v448_v60 = vpop.permute.xlu1 %447 }
 0x2c5   : > { %v450_v61 = vmul.f32 %v1560_v59, %v448_v60 }
 0x2c7   : > { %452 = vrot.lane.b32.xlu1 %v450_v61, %s1695_s4 }
 0x335   : > { %v429_v63 = vpop.permute.xlu0 %428 }
 0x336   : > { %v431_v19 = vadd.f32 %v429_v63, %v421_v62  }
 0x338   : > { %1561 = vtanh.f32 %v431_v19  ;;  %v498_v19 = vld [vmem:[%s2238_s5 + $0x78] sm:$0xff] (%p238_p0) }
 0x339   : > { %v453_v1 = vpop.permute.xlu1 %452 }
 0x33a   : > { %v455_v17 = vadd.f32 %v453_v1, %v445_v0  }
 0x33c   : > { %1563 = vtanh.f32 %v455_v17  ;;  %v493_v17 = vld [vmem:[%s2238_s5 + $0x50] sm:$0xff] (%p238_p0) }
 0x342   : > { %v1562_v2 = vpop.eup %1561 }
 0x343   : > { %434 = vrot.lane.b32.xlu0 %v1562_v2, %s1698_s12 }
 0x346   : > { %v1564_v4 = vpop.eup %1563 }
 0x347   : > { %458 = vrot.lane.b32.xlu1 %v1564_v4, %s1698_s12 }
 0x3b5   : > { %v435_v5 = vpop.permute.xlu0 %434 }
 0x3b6   : > { %v437_v20 = vmul.f32 %v1558_v56, %v435_v5  }
 0x3b8   : > { %463 = vrot.lane.b32.xlu0 %v437_v20, %s1695_s4  ;;  %v1400_v20 = vpack.c.bf16 (%p238_p0), %v493_v17, %v491_v16 }
 0x3b9   : > { %v459_v6 = vpop.permute.xlu1 %458 }
 0x3ba   : > { %v461_v18 = vmul.f32 %v1560_v59, %v459_v6   ;;  %1401 = vmatpush1.bf16.msra.mxu0 (%p238_p0), %v1400_v20  ;;  %1448 = vmatpush1.bf16.msra.mxu1 (%p238_p0), %v1400_v20 }
 0x3bc   : > { %469 = vrot.lane.b32.xlu1 %v461_v18, %s1698_s12  ;;  %v496_v18 = vld [vmem:[%s2238_s5 + $0x68] sm:$0xff] (%p238_p0) }
 0x3bd   :  { %v1402_v21 = vpack.c.bf16 (%p238_p0), %v498_v19, %v496_v18 }
 0x3bf   :  { %1403 = vmatprep.subr.bf16.mxu0 (%p238_p0), %v1402_v21  ;;  %1445 = vmatprep.subr.bf16.mxu1 (%p238_p0), %v1402_v21 }
 0x3c0   :  { %1405 = vmatpush1.bf16.msra.mxu0 (%p238_p0), %v1404_v24  ;;  %1449 = vmatpush1.bf16.msra.mxu1 (%p238_p0), %v1404_v24 }
 0x429   :  { %240 = sbr.rel (!%p238_p0) target bundleno = 248 (0xf8), region = 86 }
 0x42a   : > { %v464_v7 = vpop.permute.xlu0 %463 }
 0x42b   : > { %467 = vst.msk [vmem:[%s466_s0] sm:$0xff] %vm258_vm2, %v464_v7 }
 0x42e   : > { %v470_v8 = vpop.permute.xlu1 %469 }
 0x42f   : > { %474 = vst.msk [vmem:[%s472_s13] sm:$0xff] %vm473_vm3, %v470_v8 }
 0x436   :  { %v475_v25 = vld [vmem:[#allocation2] sm:$0xff]  ;;  %v476_v27 = vld [vmem:[#allocation2 + $0x8] sm:$0xff]  ;;  %v477_v29 = vld [vmem:[#allocation2 + $0x10] sm:$0xff] }
 0x437   :  { %v479_v26 = vld [vmem:[#allocation2 + $0x20] sm:$0xff]  ;;  %1223 = vmatmul.mubr.msk.f32.vlgmr.msra.gmra.mrb[0].mxu0 %vm74_vm0, %v475_v25  ;;  %v480_v28 = vld [vmem:[#allocation2 + $0x28] sm:$0xff]  ;;  %v481_v30 = vld [vmem:[#allocation2 + $0x30] sm:$0xff] }
 0x438   :  { %1227 = vmatmul.mubr.msk.f32.vlgmr.msra.gmra.mrb[0].mxu1 %vm74_vm0, %v479_v26  ;;  %605 = vmatprep.mubr.f32.mxu0 %v1693_v3  ;;  %v478_v31 = vld [vmem:[#allocation2 + $0x18] sm:$0xff] }
 0x439   :  { %629 = vmatprep.mubr.f32.mxu1 %v1693_v3  ;;  %v482_v32 = vld [vmem:[#allocation2 + $0x38] sm:$0xff] }
 0x43b   :  { %1224 = vmatmul.mubr.msk.f32.gmra.mrb[2].mxu0 %vm74_vm0, %v476_v27 }
 0x43c   :  { %1228 = vmatmul.mubr.msk.f32.gmra.mrb[2].mxu1 %vm74_vm0, %v480_v28  ;;  %611 = vmatprep.mubr.f32.mxu0 %v1693_v3 }
 0x43d   :  { %635 = vmatprep.mubr.f32.mxu1 %v1693_v3 }
 0x43f   :  { %1225 = vmatmul.mubr.msk.f32.gmra.mrb[4].mxu0 %vm74_vm0, %v477_v29 }
 0x440   :  { %1229 = vmatmul.mubr.msk.f32.gmra.mrb[4].mxu1 %vm74_vm0, %v481_v30  ;;  %617 = vmatprep.mubr.f32.mxu0 %v1693_v3 }
 0x441   :  { %641 = vmatprep.mubr.f32.mxu1 %v1693_v3  ;;  %v2046_v3 = vld [vmem:[%s2239_s6 + $0x10] sm:$0xff] }
 0x443   :  { %1226 = vmatmul.mubr.msk.f32.gmra.mrb[6].mxu0 %vm74_vm0, %v478_v31 }
 0x444   :  { %1230 = vmatmul.mubr.msk.f32.gmra.mrb[6].mxu1 %vm74_vm0, %v482_v32 }
 0x50a   :  { %v601_v54 = vpop.f32.mrb[0].mxu0 }
 0x50b   :  { %v625_v55 = vpop.f32.mrb[0].mxu1  ;;  %v602_v56 = vadd.f32 %v601_v54, %v504_v52  ;;  %v603_v58 = vpop.f32.mrb[1].mxu0 }
 0x50c   :  { %v626_v57 = vadd.f32 %v625_v55, %v504_v52  ;;  %v627_v59 = vpop.f32.mrb[1].mxu1  ;;  %v604_v60 = vadd.f32 %v603_v58, %v508_v53 }
 0x50d   :  { %v628_v61 = vadd.f32 %v627_v59, %v508_v53  ;;  %648 = vst [vmem:[#allocation4] sm:$0xff] %v602_v56 }
 0x50e   :  { %656 = vst [vmem:[#allocation4 + $0x40] sm:$0xff] %v626_v57  ;;  %649 = vst [vmem:[#allocation4 + $0x8] sm:$0xff] %v604_v60  ;;  %v607_v62 = vpop.f32.mrb[2].mxu0 }
 0x50f   :  { %657 = vst [vmem:[#allocation4 + $0x48] sm:$0xff] %v628_v61  ;;  %v631_v63 = vpop.f32.mrb[2].mxu1  ;;  %v608_v0 = vadd.f32 %v607_v62, %v504_v52  ;;  %v609_v43 = vpop.f32.mrb[3].mxu0 }
 0x510   :  { %v632_v1 = vadd.f32 %v631_v63, %v504_v52  ;;  %v633_v2 = vpop.f32.mrb[3].mxu1  ;;  %v610_v42 = vadd.f32 %v609_v43, %v508_v53 }
 0x511   :  { %v634_v45 = vadd.f32 %v633_v2, %v508_v53  ;;  %650 = vst [vmem:[#allocation4 + $0x10] sm:$0xff] %v608_v0 }
 0x512   :  { %658 = vst [vmem:[#allocation4 + $0x50] sm:$0xff] %v632_v1  ;;  %651 = vst [vmem:[#allocation4 + $0x18] sm:$0xff] %v610_v42  ;;  %v613_v4 = vpop.f32.mrb[4].mxu0 }
 0x513   :  { %659 = vst [vmem:[#allocation4 + $0x58] sm:$0xff] %v634_v45  ;;  %v637_v5 = vpop.f32.mrb[4].mxu1  ;;  %v614_v6 = vadd.f32 %v613_v4, %v504_v52  ;;  %v615_v8 = vpop.f32.mrb[5].mxu0 }
 0x514   :  { %v638_v7 = vadd.f32 %v637_v5, %v504_v52  ;;  %v639_v9 = vpop.f32.mrb[5].mxu1  ;;  %v616_v10 = vadd.f32 %v615_v8, %v508_v53 }
 0x515   :  { %v640_v11 = vadd.f32 %v639_v9, %v508_v53  ;;  %652 = vst [vmem:[#allocation4 + $0x20] sm:$0xff] %v614_v6 }
 0x516   :  { %660 = vst [vmem:[#allocation4 + $0x60] sm:$0xff] %v638_v7  ;;  %653 = vst [vmem:[#allocation4 + $0x28] sm:$0xff] %v616_v10  ;;  %v619_v12 = vpop.f32.mrb[6].mxu0 }
 0x517   :  { %661 = vst [vmem:[#allocation4 + $0x68] sm:$0xff] %v640_v11  ;;  %v643_v33 = vpop.f32.mrb[6].mxu1  ;;  %v620_v34 = vadd.f32 %v619_v12, %v504_v52  ;;  %v621_v36 = vpop.f32.mrb[7].mxu0 }
 0x518   :  { %v644_v35 = vadd.f32 %v643_v33, %v504_v52  ;;  %v645_v37 = vpop.f32.mrb[7].mxu1  ;;  %v622_v38 = vadd.f32 %v621_v36, %v508_v53 }
 0x519   :  { %v646_v39 = vadd.f32 %v645_v37, %v508_v53  ;;  %654 = vst [vmem:[#allocation4 + $0x30] sm:$0xff] %v620_v34 }
 0x51a   :  { %662 = vst [vmem:[#allocation4 + $0x70] sm:$0xff] %v644_v35  ;;  %655 = vst [vmem:[#allocation4 + $0x38] sm:$0xff] %v622_v38 }
 0x51b   :  { %663 = vst [vmem:[#allocation4 + $0x78] sm:$0xff] %v646_v39 }
 0x51c LB: > { %v1407_v16 = vpack.c.bf16 %v2041_v44, %v2036_v41  ;;  %v1699_v17 = vmov 0.0|0.0   ;;  %v1413_v18 = vpack.c.bf16 %v2061_v48, %v2056_v47  ;;  %s1700_s8 = smov 32   ;;  %v1410_v19 = vpack.c.bf16 %v2051_v46, %v2046_v3  ;;  %s1231_s14 = sshll.u32 %s1691_s7, 3  ;;  %s1691_s7 = sphi %s2088_s7, %s677_s7   ;;  %v1687_v15 = vphi %v2086_v15, %v873_v15   ;;  %v1683_v14 = vphi %v2084_v14, %v867_v14   ;;  %v1679_v13 = vphi %v2082_v13, %v897_v13   ;;  %v1675_v40 = vphi %v2080_v40, %v891_v40  }
 0x51d   : > { %1406 = vmatprep.subr.bf16.mxu0 %v1699_v17  ;;  %1412 = vmatprep.subr.bf16.mxu1 %v1699_v17  ;;  %v1416_v20 = vpack.c.bf16 %v2071_v50, %v2066_v49  ;;  %vm1701_vm4 = vmmov 0   ;;  %v1702_v21 = vmov 0.0   ;;  %s683_s1 = ssub.s32 7, %s1691_s7  ;;  %s685_s15 = sshra.s32 %s1231_s14, 3 }
 0x51e   : > { %692 = vrot.lane.b32.xlu0 %v1687_v15, %s1700_s8  ;;  %1408 = vmatpush3.bf16.msra.mxu0 %v1407_v16  ;;  %s2117_s16 = sshll.u32 %s683_s1, 3  ;;  %s1252_s17 = sshll.u32 %s685_s15, 4 }
 0x51f   : > { %1409 = vmatprep.subr.bf16.mxu0 %v1699_v17  ;;  %1414 = vmatpush3.bf16.msra.mxu1 %v1413_v18  ;;  %s768_s18 = sshra.s32 %s2117_s16, 3  ;;  %s689_s20 = scalar_lea.vmem [#allocation4], %s1252_s17 }
 0x520   : > { %1320 = vmatprep.mubr.msk.f32.mxu0 %vm1701_vm4, %v1702_v21  ;;  %1415 = vmatprep.subr.bf16.mxu1 %v1699_v17  ;;  %s1253_s19 = sshll.u32 %s768_s18, 4  ;;  %s1703_s2 = smov 64  }
 0x521   : > { %1331 = vmatprep.mubr.msk.f32.mxu1 %vm1701_vm4, %v1702_v21  ;;  %s772_s5 = scalar_lea.vmem [#allocation4], %s1253_s19  ;;  %s902_s21 = scalar_lea.vmem [#allocation3], %s1231_s14 }
 0x522   : > { %775 = vrot.lane.b32.xlu0 %v1679_v13, %s1700_s8  ;;  %1411 = vmatpush3.bf16.msra.mxu0 %v1410_v19  ;;  %v690_v24 = vld [vmem:[%s689_s20] sm:$0xff]  ;;  %v773_v28 = vld [vmem:[%s772_s5 + $0x8] sm:$0xff]  ;;  %s908_s3 = scalar_lea.vmem [#allocation3], %s2117_s16  ;;  %s677_s7 = sadd.s32 1, %s1691_s7  }
 0x523   : > { %1417 = vmatpush3.bf16.msra.mxu1 %v1416_v20  ;;  %p674_p1 = scmp.ge.s32.totalorder %s677_s7, 8  }
 0x524   :  { %v919_v8 = vld [vmem:[%s2242_s9] sm:$0xff] (%p674_p1)  ;;  %v920_v9 = vld [vmem:[%s2242_s9 + $0x8] sm:$0xff] (%p674_p1)  ;;  %v921_v10 = vld [vmem:[%s2242_s9 + $0x10] sm:$0xff] (%p674_p1) }
 0x525   :  { %v1418_v11 = vpack.c.bf16 (%p674_p1), %v920_v9, %v919_v8  ;;  %v922_v12 = vld [vmem:[%s2242_s9 + $0x18] sm:$0xff] (%p674_p1)  ;;  %v923_v41 = vld [vmem:[%s2242_s9 + $0x20] sm:$0xff] (%p674_p1)  ;;  %v924_v44 = vld [vmem:[%s2242_s9 + $0x28] sm:$0xff] (%p674_p1) }
 0x526   :  { %v1422_v33 = vpack.c.bf16 (%p674_p1), %v922_v12, %v921_v10  ;;  %v1426_v47 = vpack.c.bf16 (%p674_p1), %v924_v44, %v923_v41  ;;  %v925_v48 = vld [vmem:[%s2242_s9 + $0x30] sm:$0xff] (%p674_p1)  ;;  %v926_v49 = vld [vmem:[%s2242_s9 + $0x38] sm:$0xff] (%p674_p1) }
 0x527   :  { %1419 = vmatprep.subr.bf16.mxu0 (%p674_p1), %v1418_v11  ;;  %1450 = vmatprep.subr.bf16.mxu1 (%p674_p1), %v1418_v11  ;;  %v1430_v50 = vpack.c.bf16 (%p674_p1), %v926_v49, %v925_v48 }
 0x590   : > { %v693_v22 = vpop.permute.xlu0 %692 }
 0x591   : > { %1321 = vmatmul.mubr.msk.f32.vlgmr.msra.gmra.mrb[0].mxu0 %vm258_vm2, %v693_v22 }
 0x592   :  { %1421 = vmatpush3.bf16.msra.mxu0 (%p674_p1), %v1418_v11 }
 0x593   :  { %1423 = vmatprep.subr.bf16.mxu0 (%p674_p1), %v1422_v33 }
 0x594   : > { %v776_v23 = vpop.permute.xlu0 %775 }
 0x595   : > { %1332 = vmatmul.mubr.msk.f32.vlgmr.msra.gmra.mrb[0].mxu1 %vm258_vm2, %v776_v23 }
 0x596   :  { %1454 = vmatpush3.bf16.msra.mxu1 (%p674_p1), %v1418_v11  ;;  %1425 = vmatpush3.bf16.msra.mxu0 (%p674_p1), %v1422_v33 }
 0x597   :  { %1451 = vmatprep.subr.bf16.mxu1 (%p674_p1), %v1422_v33  ;;  %1427 = vmatprep.subr.bf16.mxu0 (%p674_p1), %v1426_v47 }
 0x59a   :  { %1455 = vmatpush3.bf16.msra.mxu1 (%p674_p1), %v1422_v33  ;;  %1429 = vmatpush3.bf16.msra.mxu0 (%p674_p1), %v1426_v47 }
 0x59b   :  { %1452 = vmatprep.subr.bf16.mxu1 (%p674_p1), %v1426_v47  ;;  %1431 = vmatprep.subr.bf16.mxu0 (%p674_p1), %v1430_v50 }
 0x59e   :  { %1456 = vmatpush3.bf16.msra.mxu1 (%p674_p1), %v1426_v47  ;;  %1433 = vmatpush3.bf16.msra.mxu0 (%p674_p1), %v1430_v50 }
 0x59f   :  { %1453 = vmatprep.subr.bf16.mxu1 (%p674_p1), %v1430_v50 }
 0x5a2   :  { %1457 = vmatpush3.bf16.msra.mxu1 (%p674_p1), %v1430_v50 }
 0x664   : > { %v763_v25 = vpop.f32.mrb[0].mxu0 }
 0x665   : > { %v767_v26 = vadd.f32 %v763_v25, %v690_v24  ;;  %v1322_v27 = vpop.f32.mrb[1].mxu0 }
 0x667   : > { %1565 = vtanh.f32 %v767_v26  ;;  %v1239_v52 = vmul.f32 -1.442695, %v767_v26 }
 0x668   : > { %v845_v29 = vpop.f32.mrb[0].mxu1 }
 0x669   : > { %v849_v30 = vadd.f32 %v845_v29, %v773_v28  ;;  %v1333_v31 = vpop.f32.mrb[1].mxu1 }
 0x66b   : > { %1567 = vtanh.f32 %v849_v30  ;;  %v1240_v53 = vmul.f32 -1.442695, %v849_v30 }
 0x66c   : > { %1569 = vpow2.f32 %v1239_v52 }
 0x66d   : > { %1571 = vpow2.f32 %v1240_v53 }
 0x671   : > { %v1566_v32 = vpop.eup %1565 }
 0x672   : > { %859 = vrot.lane.b32.xlu1 %v1566_v32, %s1703_s2 }
 0x675   : > { %v1568_v51 = vpop.eup %1567 }
 0x676   : > { %883 = vrot.lane.b32.xlu1 %v1568_v51, %s1703_s2  ;;  %v1570_v54 = vpop.eup %1569 }
 0x677   : > { %v853_v55 = vadd.f32 1.0, %v1570_v54  ;;  %v1572_v56 = vpop.eup %1571 }
 0x678   : > { %v877_v57 = vadd.f32 1.0, %v1572_v56 }
 0x679   : > { %1573 = vrcp.f32 %v853_v55 }
 0x67a   : > { %1575 = vrcp.f32 %v877_v57 }
 0x683   : > { %v1574_v58 = vpop.eup %1573 }
 0x684   : > { %v1576_v61 = vpop.eup %1575  ;;  %v857_v0 = vmul.f32 %v1683_v14, %v1574_v58 }
 0x685   : > { %v881_v43 = vmul.f32 %v1675_v40, %v1576_v61 }
 0x6e4   : > { %v860_v59 = vpop.permute.xlu1 %859 }
 0x6e5   : > { %v862_v60 = vmul.f32 %v1574_v58, %v860_v59 }
 0x6e7   : > { %864 = vrot.lane.b32.xlu0 %v862_v60, %s1700_s8 }
 0x6e8   : > { %v884_v62 = vpop.permute.xlu1 %883 }
 0x6e9   : > { %v886_v63 = vmul.f32 %v1576_v61, %v884_v62 }
 0x6eb   : > { %888 = vrot.lane.b32.xlu1 %v886_v63, %s1700_s8 }
 0x759   : > { %v865_v1 = vpop.permute.xlu0 %864 }
 0x75a   : > { %v867_v14 = vadd.f32 %v865_v1, %v857_v0  }
 0x75c   : > { %1577 = vtanh.f32 %v867_v14 }
 0x75d   : > { %v889_v2 = vpop.permute.xlu1 %888 }
 0x75e   : > { %v891_v40 = vadd.f32 %v889_v2, %v881_v43  }
 0x760   : > { %1579 = vtanh.f32 %v891_v40  ;;  %v1241_v40 = vld [vmem:[%s2243_s10] ss:$0 sm:$0xff] (%p674_p1) }
 0x766   : > { %v1578_v42 = vpop.eup %1577 }
 0x767   : > { %870 = vrot.lane.b32.xlu0 %v1578_v42, %s1703_s2 }
 0x76a   : > { %v1580_v45 = vpop.eup %1579 }
 0x76b   : > { %894 = vrot.lane.b32.xlu1 %v1580_v45, %s1703_s2 }
 0x7d9   : > { %v871_v4 = vpop.permute.xlu0 %870 }
 0x7da   : > { %v873_v15 = vmul.f32 %v1574_v58, %v871_v4  }
 0x7dc   : > { %899 = vrot.lane.b32.xlu0 %v873_v15, %s1700_s8 }
 0x7dd   : > { %v895_v5 = vpop.permute.xlu1 %894 }
 0x7de   : > { %v897_v13 = vmul.f32 %v1576_v61, %v895_v5  }
 0x7e0   : > { %905 = vrot.lane.b32.xlu1 %v897_v13, %s1703_s2 }
 0x84d   :  { %676 = sbr.rel (!%p674_p1) target bundleno = 1308 (0x51c), region = 97 }
 0x84e   : > { %v900_v6 = vpop.permute.xlu0 %899 }
 0x84f   : > { %903 = vst.msk [vmem:[%s902_s21] sm:$0xff] %vm258_vm2, %v900_v6 }
 0x852   : > { %v906_v7 = vpop.permute.xlu1 %905 }
 0x853   : > { %910 = vst.msk [vmem:[%s908_s3] sm:$0xff] %vm473_vm3, %v906_v7 }
 0x85a   :  { %v911_v3 = vld [vmem:[#allocation3] sm:$0xff]  ;;  %v912_v34 = vld [vmem:[#allocation3 + $0x8] sm:$0xff]  ;;  %v913_v36 = vld [vmem:[#allocation3 + $0x10] sm:$0xff] }
 0x85b   :  { %v915_v46 = vld [vmem:[#allocation3 + $0x20] sm:$0xff]  ;;  %1350 = vmatprep.mubr.msk.f32.mxu0 %vm74_vm0, %v911_v3  ;;  %v916_v35 = vld [vmem:[#allocation3 + $0x28] sm:$0xff]  ;;  %v917_v37 = vld [vmem:[#allocation3 + $0x30] sm:$0xff] }
 0x85c   :  { %1356 = vmatprep.mubr.msk.f32.mxu1 %vm74_vm0, %v915_v46  ;;  %1351 = vmatmul.mubr.msk.f32.vlgmr.msra.gmra.mrb[0].mxu0 %vm74_vm0, %v912_v34  ;;  %v914_v38 = vld [vmem:[#allocation3 + $0x18] sm:$0xff] }
 0x85d   :  { %1357 = vmatmul.mubr.msk.f32.vlgmr.msra.gmra.mrb[0].mxu1 %vm74_vm0, %v916_v35  ;;  %1353 = vmatprep.mubr.msk.f32.mxu0 %vm74_vm0, %v913_v36  ;;  %v918_v39 = vld [vmem:[#allocation3 + $0x38] sm:$0xff] }
 0x85e   :  { %1359 = vmatprep.mubr.msk.f32.mxu1 %vm74_vm0, %v917_v37 }
 0x860   :  { %1354 = vmatmul.mubr.msk.f32.gmra.mrb[2].mxu0 %vm74_vm0, %v914_v38 }
 0x861   :  { %1360 = vmatmul.mubr.msk.f32.gmra.mrb[2].mxu1 %vm74_vm0, %v918_v39 }
 0x92f   :  { %v1352_v13 = vpop.f32.mrb[0].mxu0 }
 0x930   :  { %v1358_v14 = vpop.f32.mrb[0].mxu1  ;;  %v1030_v15 = vadd.f32 %v1352_v13, %v1241_v40  ;;  %v1024_v17 = vpop.f32.mrb[1].mxu0 }
 0x931   :  { %v1050_v16 = vadd.f32 %v1358_v14, %v1241_v40  ;;  %v1044_v18 = vpop.f32.mrb[1].mxu1  ;;  %v1025_v21 = vadd.f32 %v1241_v40, %v1024_v17 }
 0x932   :  { %1065 = vmax.xlane.f32.xlu0 %v1030_v15  ;;  %v1045_v26 = vadd.f32 %v1241_v40, %v1044_v18 }
 0x933   :  { %1073 = vmax.xlane.f32.xlu1 %v1050_v16  ;;  %v1355_v19 = vpop.f32.mrb[2].mxu0 }
 0x934   :  { %v1361_v20 = vpop.f32.mrb[2].mxu1  ;;  %v1040_v22 = vadd.f32 %v1355_v19, %v1241_v40  ;;  %v1034_v23 = vpop.f32.mrb[3].mxu0 }
 0x935   :  { %v1054_v24 = vpop.f32.mrb[3].mxu1  ;;  %v1035_v25 = vadd.f32 %v1241_v40, %v1034_v23  ;;  %v1060_v27 = vadd.f32 %v1361_v20, %v1241_v40 }
 0x936   :  { %1063 = vmax.xlane.f32.xlu0 %v1025_v21  ;;  %v1055_v28 = vadd.f32 %v1241_v40, %v1054_v24 }
 0x937   :  { %1069 = vmax.xlane.f32.xlu1 %v1040_v22 }
 0x93a   :  { %1071 = vmax.xlane.f32.xlu0 %v1045_v26 }
 0x93b   :  { %1067 = vmax.xlane.f32.xlu1 %v1035_v25 }
 0x93e   :  { %1075 = vmax.xlane.f32.xlu0 %v1055_v28 }
 0x93f   :  { %1077 = vmax.xlane.f32.xlu1 %v1060_v27 }
 0x9bf   :  { %v1066_v30 = vpop.xlane.xlu0 %1065 }
 0x9c0   :  { %v1074_v29 = vpop.xlane.xlu1 %1073  ;;  %v2183_v32 = vsub.f32 %v1030_v15, %v1066_v30 }
 0x9c1   :  { %v2181_v31 = vsub.f32 %v1050_v16, %v1074_v29 }
 0x9c2   :  { %v1089_v51 = vmul.f32 1.442695, %v2183_v32 }
 0x9c3   :  { %v1064_v53 = vpop.xlane.xlu0 %1063  ;;  %v1097_v54 = vmul.f32 1.442695, %v2181_v31 }
 0x9c4   :  { %v1070_v52 = vpop.xlane.xlu1 %1069  ;;  %v2189_v56 = vsub.f32 %v1025_v21, %v1064_v53  ;;  %1581 = vpow2.f32 %v1089_v51 }
 0x9c5   :  { %v2187_v55 = vsub.f32 %v1040_v22, %v1070_v52  ;;  %1583 = vpow2.f32 %v1097_v54 }
 0x9c6   :  { %v1087_v57 = vmul.f32 1.442695, %v2189_v56 }
 0x9c7   :  { %v1072_v59 = vpop.xlane.xlu0 %1071  ;;  %v1093_v60 = vmul.f32 1.442695, %v2187_v55 }
 0x9c8   :  { %v1068_v58 = vpop.xlane.xlu1 %1067  ;;  %v2193_v61 = vsub.f32 %v1045_v26, %v1072_v59  ;;  %1585 = vpow2.f32 %v1087_v57 }
 0x9c9   :  { %v2195_v62 = vsub.f32 %v1035_v25, %v1068_v58  ;;  %1587 = vpow2.f32 %v1093_v60 }
 0x9ca   :  { %v1095_v63 = vmul.f32 1.442695, %v2193_v61 }
 0x9cb   :  { %v1076_v1 = vpop.xlane.xlu0 %1075  ;;  %v1091_v2 = vmul.f32 1.442695, %v2195_v62 }
 0x9cc   :  { %v1078_v0 = vpop.xlane.xlu1 %1077  ;;  %1589 = vpow2.f32 %v1095_v63  ;;  %v2201_v42 = vsub.f32 %v1055_v28, %v1076_v1 }
 0x9cd   :  { %v2198_v43 = vsub.f32 %v1060_v27, %v1078_v0 }
 0x9ce   :  { %v1582_v4 = vpop.eup %1581  ;;  %v1099_v5 = vmul.f32 1.442695, %v2201_v42 }
 0x9cf   :  { %v1101_v45 = vmul.f32 1.442695, %v2198_v43  ;;  %1105 = vadd.xlane.f32.xlu1 %v1582_v4  ;;  %v1584_v6 = vpop.eup %1583 }
 0x9d1   :  { %1591 = vpow2.f32 %v1101_v45 }
 0x9d2   :  { %1593 = vpow2.f32 %v1091_v2  ;;  %v1586_v7 = vpop.eup %1585 }
 0x9d3   :  { %1113 = vadd.xlane.f32.xlu1 %v1584_v6  ;;  %1103 = vadd.xlane.f32.xlu0 %v1586_v7  ;;  %1595 = vpow2.f32 %v1099_v5  ;;  %v1588_v8 = vpop.eup %1587 }
 0x9d6   :  { %v1590_v9 = vpop.eup %1589 }
 0x9d7   :  { %1109 = vadd.xlane.f32.xlu1 %v1588_v8  ;;  %1111 = vadd.xlane.f32.xlu0 %v1590_v9 }
 0x9db   :  { %v1592_v10 = vpop.eup %1591 }
 0x9dc   :  { %v1594_v11 = vpop.eup %1593  ;;  %1117 = vadd.xlane.f32.xlu1 %v1592_v10 }
 0x9dd   :  { %1107 = vadd.xlane.f32.xlu0 %v1594_v11  ;;  %v1596_v12 = vpop.eup %1595 }
 0x9e1   :  { %1115 = vadd.xlane.f32.xlu0 %v1596_v12 }
 0xa5c   :  { %v1106_v33 = vpop.xlane.xlu1 %1105 }
 0xa5d   :  { %1597 = vlog2.f32 %v1106_v33 }
 0xa60   :  { %v1114_v41 = vpop.xlane.xlu1 %1113  ;;  %v1104_v44 = vpop.xlane.xlu0 %1103 }
 0xa61   :  { %1599 = vlog2.f32 %v1114_v41 }
 0xa62   :  { %1601 = vlog2.f32 %v1104_v44 }
 0xa64   :  { %v1110_v3 = vpop.xlane.xlu1 %1109  ;;  %v1112_v46 = vpop.xlane.xlu0 %1111 }
 0xa65   :  { %1603 = vlog2.f32 %v1110_v3 }
 0xa66   :  { %1605 = vlog2.f32 %v1112_v46 }
 0xa67   :  { %v1598_v47 = vpop.eup %1597 }
 0xa68   :  { %v1122_v48 = vmul.f32 0.6931472, %v1598_v47 }
 0xa69   :  { %v1118_v49 = vpop.xlane.xlu1 %1117 }
 0xa6a   :  { %v1108_v50 = vpop.xlane.xlu0 %1107  ;;  %1607 = vlog2.f32 %v1118_v49  ;;  %v1136_v34 = vsub.f32 %v2183_v32, %v1122_v48 }
 0xa6b   :  { %1609 = vlog2.f32 %v1108_v50  ;;  %v1600_v35 = vpop.eup %1599 }
 0xa6c   :  { %v1602_v36 = vpop.eup %1601  ;;  %1144 = vst [vmem:[%s2244_s11 + $0x8] sm:$0xff] %v1136_v34  ;;  %v1130_v37 = vmul.f32 0.6931472, %v1600_v35 }
 0xa6d   :  { %v1120_v39 = vmul.f32 0.6931472, %v1602_v36 }
 0xa6e   :  { %v1116_v38 = vpop.xlane.xlu0 %1115  ;;  %v1140_v40 = vsub.f32 %v2181_v31, %v1130_v37 }
 0xa6f   :  { %1611 = vlog2.f32 %v1116_v38  ;;  %v1604_v13 = vpop.eup %1603  ;;  %v1135_v14 = vsub.f32 %v2189_v56, %v1120_v39 }
 0xa70   :  { %v1606_v15 = vpop.eup %1605  ;;  %1148 = vst [vmem:[%s2244_s11 + $0x28] sm:$0xff] %v1140_v40  ;;  %v1126_v16 = vmul.f32 0.6931472, %v1604_v13 }
 0xa71   :  { %1143 = vst [vmem:[%s2244_s11] sm:$0xff] %v1135_v14  ;;  %v1128_v17 = vmul.f32 0.6931472, %v1606_v15 }
 0xa72   :  { %v1138_v18 = vsub.f32 %v2187_v55, %v1126_v16 }
 0xa73   :  { %v1139_v20 = vsub.f32 %v2193_v61, %v1128_v17 }
 0xa74   :  { %v1608_v19 = vpop.eup %1607  ;;  %1146 = vst [vmem:[%s2244_s11 + $0x18] sm:$0xff] %v1138_v18 }
 0xa75   :  { %v1610_v21 = vpop.eup %1609  ;;  %v1134_v22 = vmul.f32 0.6931472, %v1608_v19  ;;  %1147 = vst [vmem:[%s2244_s11 + $0x20] sm:$0xff] %v1139_v20 }
 0xa76   :  { %v1124_v23 = vmul.f32 0.6931472, %v1610_v21 }
 0xa77   :  { %v1142_v24 = vsub.f32 %v2198_v43, %v1134_v22 }
 0xa78   :  { %v1137_v26 = vsub.f32 %v2195_v62, %v1124_v23 }
 0xa79   :  { %v1612_v25 = vpop.eup %1611  ;;  %1150 = vst [vmem:[%s2244_s11 + $0x38] sm:$0xff] %v1142_v24 }
 0xa7a   :  { %v1132_v27 = vmul.f32 0.6931472, %v1612_v25  ;;  %1145 = vst [vmem:[%s2244_s11 + $0x10] sm:$0xff] %v1137_v26 }
 0xa7c   :  { %v1141_v28 = vsub.f32 %v2201_v42, %v1132_v27 }
 0xa7e   :  { %1149 = vst [vmem:[%s2244_s11 + $0x30] sm:$0xff] %v1141_v28 }

</bundles_post_ra>
